<compile_context>
chip_gen: v6e
topology: v6e:2x2x1
jax: 0.10.0
libtpu: 0.0.40
codegen_flags: <defaults>
</compile_context>

<pallas_src>
import jax
import jax.numpy as jnp
from jax.experimental import pallas as pl
from jax.experimental.pallas import tpu as pltpu


# ----------------------------- helpers ------------------------------------


def _align(v, m):
    return ((v + m - 1) // m) * m


def _cdiv(a, b):
    return -(-a // b)


def _vmem_capacity_bytes():
    """Physical VMEM per TensorCore (falls back to the smallest, v7x-safe value)."""
    try:
        info = pltpu.get_tpu_info()
        cap = getattr(info, "vmem_capacity_bytes", None)
        if cap:
            return int(cap)
    except Exception:
        pass
    return 64 << 20


def _choose_tk(d, tk=None):
    """Return (TK, d_pad). Prefer a single K step (TK == d) whenever it fits."""
    cap = _align(tk, 128) if tk is not None else 2048
    if d <= cap:
        return d, d            # single K step, no padding of the feature dim
    return cap, _align(d, cap)  # K-tiled fallback for very large D


# ----------------------------- kernel --------------------------------------


def _proto_dist_kernel(x_ref, pt_ref, yy_ref, o_ref, xx_ref):
    """Grid = (M tiles, P tiles, K tiles); K (reduction) is the last axis.

    o_ref (f32, block index constant over k) doubles as the accumulator.
    xx_ref is a (TM, 1) f32 scratch accumulating the x row norms over k.
    """
    k = pl.program_id(2)

    @pl.when(k == 0)
    def _():
        o_ref[...] = jnp.zeros_like(o_ref)
        xx_ref[...] = jnp.zeros_like(xx_ref)

    xt = x_ref[...]
    # MXU work: native-dtype operands, f32 accumulation into the output block.
    o_ref[...] += jnp.dot(xt, pt_ref[...], preferred_element_type=jnp.float32)
    # Row norms ride the VPU/XLU slots (slack while MXU/DMA dominate).
    xt32 = xt.astype(jnp.float32)
    xx_ref[...] += jnp.sum(xt32 * xt32, axis=1, keepdims=True)

    @pl.when(k == pl.num_programs(2) - 1)
    def _():
        acc = o_ref[...]
        # xx (TM,1) + yy (1,TN) broadcast; -2*acc folded as -(acc + acc).
        o_ref[...] = (xx_ref[...] + yy_ref[...] - (acc + acc)).astype(o_ref.dtype)


# ----------------------------- wrapper --------------------------------------


def prepare_prototypes(prototype_vectors, *, matmul_dtype=None, tk=None):
    """One-time (per-parameter) preprocessing: transpose, pad P to a lane-dense
    multiple of 128, compute ||p_j||^2 in f32. Hoisted out of the forward path."""
    p, d = prototype_vectors.shape
    pv32 = prototype_vectors.astype(jnp.float32)
    yy = jnp.sum(pv32 * pv32, axis=1, keepdims=True).T  # (1, P), exact f32

    p_pad = _align(p, 128)
    tk_sel, d_pad = _choose_tk(d, tk)
    mm_dtype = matmul_dtype if matmul_dtype is not None else prototype_vectors.dtype

    pt = prototype_vectors.astype(mm_dtype).T  # (D, P) -- straight MXU feed
    if (d_pad, p_pad) != (d, p):
        pt = jnp.pad(pt, ((0, d_pad - d), (0, p_pad - p)))
    if p_pad != p:
        yy = jnp.pad(yy, ((0, 0), (0, p_pad - p)))

    return {
        "pt": pt, "yy": yy,
        "p": p, "d": d,
        "p_pad": p_pad, "d_pad": d_pad,
        "tk": tk_sel, "matmul_dtype": mm_dtype,
    }


def prototype_layer_forward(x, prototype_vectors=None, *, prepared=None,
                            tm=None, tn=None, tk=None, matmul_dtype=None):
    """Pairwise squared distances between x (N, D) and prototypes (P, D).

    Returns a float32 array of shape (N, P). Pass `prepared=prepare_prototypes(...)`
    to amortize prototype preprocessing across calls.
    """
    if prepared is None:
        assert prototype_vectors is not None
        prepared = prepare_prototypes(prototype_vectors,
                                      matmul_dtype=matmul_dtype, tk=tk)

    n, d = x.shape
    assert d == prepared["d"], "feature dims must match"

    pt = prepared["pt"]
    yy = prepared["yy"]
    p = prepared["p"]
    p_pad = prepared["p_pad"]
    d_pad = prepared["d_pad"]
    TK = prepared["tk"]
    mm_dtype = prepared["matmul_dtype"]

    x_mm = x if x.dtype == mm_dtype else x.astype(mm_dtype)
    if d_pad != d:
        # Only the contraction axis ever needs zero padding (garbage in K
        # would corrupt valid outputs); N is never padded.
        x_mm = jnp.pad(x_mm, ((0, 0), (0, d_pad - d)))

    # Generation-aware VMEM budget and tile caps.
    vmem_cap = _vmem_capacity_bytes()
    small_vmem = vmem_cap <= (64 << 20)            # v7x-class TensorCore
    vmem_limit = int(min((vmem_cap * 3) // 4, 100 << 20))

    tm_cap = 256 if small_vmem else 512
    tn_cap = 512 if small_vmem else 1024

    # Overrides are rounded to sublane (8) / lane (128) alignment.
    TM = min(_align(tm, 8) if tm is not None else tm_cap, n)
    TN = min(_align(tn, 128) if tn is not None else tn_cap, p_pad)

    grid_m = _cdiv(n, TM)
    grid_n = _cdiv(p_pad, TN)

    # Make sure both TensorCores (v7x) get work when the output is a single tile.
    if grid_m * grid_n == 1 and tm is None and tn is None:
        if p_pad >= 256:
            TN = _align(_cdiv(p_pad, 2), 128)
            grid_n = _cdiv(p_pad, TN)
        elif n >= 16:
            TM = _align(_cdiv(n, 2), 8)
            grid_m = _cdiv(n, TM)

    grid_k = d_pad // TK
    grid = (grid_m, grid_n, grid_k)

    out = pl.pallas_call(
        _proto_dist_kernel,
        out_shape=jax.ShapeDtypeStruct((n, p_pad), jnp.float32),
        grid_spec=pltpu.PrefetchScalarGridSpec(
            num_scalar_prefetch=0,
            grid=grid,
            in_specs=[
                pl.BlockSpec((TM, TK), lambda i, j, k: (i, k)),   # x tile
                pl.BlockSpec((TK, TN), lambda i, j, k: (k, j)),   # prototypes^T tile
                pl.BlockSpec((1, TN), lambda i, j, k: (0, j)),    # ||p||^2 norms
            ],
            out_specs=pl.BlockSpec((TM, TN), lambda i, j, k: (i, j)),
            scratch_shapes=[pltpu.VMEM((TM, 1), jnp.float32)],    # ||x||^2 accumulator
        ),
        compiler_params=pltpu.CompilerParams(
            dimension_semantics=("parallel", "parallel", "arbitrary"),
            vmem_limit_bytes=vmem_limit,
        ),
    )(x_mm, pt, yy)

    return out if p_pad == p else out[:, :p]


def reference_forward(x, prototype_vectors):
    x32 = x.astype(jnp.float32)
    pv32 = prototype_vectors.astype(jnp.float32)
    xx = jnp.sum(x32 * x32, axis=1)[:, None]
    yy = jnp.sum(pv32 * pv32, axis=1)[None, :]
    return xx + yy - 2.0 * (x32 @ pv32.T)


if __name__ == "__main__":
    key = jax.random.PRNGKey(0)
    k_x, k_p, k_x2, k_p2 = jax.random.split(key, 4)

    # --- small shapes consistent with the module (batch=8, input_dim=32,
    #     n_prototype_vectors=16) ---
    N, D, P = 8, 32, 16
    x = jax.random.normal(k_x, (N, D), dtype=jnp.float32)
    prototype_vectors = jax.random.uniform(k_p, (P, D), dtype=jnp.float32)

    prepared = prepare_prototypes(prototype_vectors)   # hoisted param preprocessing
    out = prototype_layer_forward(x, prepared=prepared)
    out = jax.block_until_ready(out)
    ref = reference_forward(x, prototype_vectors)
    assert out.shape == (N, P)
    assert jnp.allclose(out, ref, atol=1e-4, rtol=1e-4), "mismatch vs reference"

    # --- opt-in bf16 MXU feeding (f32 accumulation / norms), looser tolerance ---
    out_bf = prototype_layer_forward(x, prototype_vectors, matmul_dtype=jnp.bfloat16)
    out_bf = jax.block_until_ready(out_bf)
    assert jnp.allclose(out_bf, ref, atol=0.5, rtol=5e-2), "mismatch (bf16 path)"

    # --- case exercising the full (M, N, K) grid + resident-output accumulation ---
    N2, D2, P2 = 64, 256, 256
    x2 = jax.random.normal(k_x2, (N2, D2), dtype=jnp.float32)
    pv2 = jax.random.uniform(k_p2, (P2, D2), dtype=jnp.float32)
    out2 = prototype_layer_forward(x2, pv2, tm=32, tn=128, tk=128)  # grid (2,2,2)
    out2 = jax.block_until_ready(out2)
    ref2 = reference_forward(x2, pv2)
    assert out2.shape == (N2, P2)
    assert jnp.allclose(out2, ref2, atol=1e-3, rtol=1e-4), "mismatch vs reference (tiled)"

    print("KERNEL_OK")
</pallas_src>

<mosaic_0001>
module attributes {stable_mosaic.version = 11 : i64} {
  func.func @_proto_dist_kernel(%arg0: i32, %arg1: i32, %arg2: i32, %arg3: memref<8x32xf32, #tpu.memory_space<vmem>>, %arg4: memref<32x128xf32, #tpu.memory_space<vmem>>, %arg5: memref<1x128xf32, #tpu.memory_space<vmem>>, %arg6: memref<8x128xf32, #tpu.memory_space<vmem>>, %arg7: memref<8x1xf32, #tpu.memory_space<vmem>>) attributes {dimension_semantics = [#tpu.dimension_semantics<parallel>, #tpu.dimension_semantics<parallel>, #tpu.dimension_semantics<arbitrary>], iteration_bounds = array<i64: 1, 1, 1>, scalar_prefetch = 0 : i64, scratch_operands = 1 : i64, tpu.core_type = #tpu.core_type<tc>, window_params = [{transform_indices = @transform_0, window_bounds = array<i64: 8, 32>}, {transform_indices = @transform_1, window_bounds = array<i64: 32, 128>}, {transform_indices = @transform_2, window_bounds = array<i64: 1, 128>}, {transform_indices = @transform_3, window_bounds = array<i64: 8, 128>}]} {
    %c0_i32 = arith.constant 0 : i32
    %0 = arith.cmpi eq, %arg2, %c0_i32 : i32
    %1 = arith.extui %0 : i1 to i32
    %c0_i32_0 = arith.constant 0 : i32
    %2 = arith.cmpi ne, %1, %c0_i32_0 : i32
    scf.if %2 {
      %cst_15 = arith.constant 0.000000e+00 : f32
      %18 = vector.broadcast %cst_15 : f32 to vector<8x128xf32>
      %c0_16 = arith.constant 0 : index
      %c0_17 = arith.constant 0 : index
      %19 = vector.load %arg6[%c0_16, %c0_17] : memref<8x128xf32, #tpu.memory_space<vmem>>, vector<8x128xf32>
      tpu.vector_store %arg6[%c0_16, %c0_17], %18 {strides = array<i32>} : memref<8x128xf32, #tpu.memory_space<vmem>>, vector<8x128xf32>,
      %cst_18 = arith.constant 0.000000e+00 : f32
      %20 = vector.broadcast %cst_18 : f32 to vector<8x1xf32>
      %c0_19 = arith.constant 0 : index
      %c0_20 = arith.constant 0 : index
      %21 = vector.load %arg7[%c0_19, %c0_20] : memref<8x1xf32, #tpu.memory_space<vmem>>, vector<8x1xf32>
      tpu.vector_store %arg7[%c0_19, %c0_20], %20 {strides = array<i32>} : memref<8x1xf32, #tpu.memory_space<vmem>>, vector<8x1xf32>,
    } else {
    }
    %c0 = arith.constant 0 : index
    %c0_1 = arith.constant 0 : index
    %3 = vector.load %arg3[%c0, %c0_1] : memref<8x32xf32, #tpu.memory_space<vmem>>, vector<8x32xf32>
    %c0_2 = arith.constant 0 : index
    %c0_3 = arith.constant 0 : index
    %4 = vector.load %arg6[%c0_2, %c0_3] : memref<8x128xf32, #tpu.memory_space<vmem>>, vector<8x128xf32>
    %c0_4 = arith.constant 0 : index
    %c0_5 = arith.constant 0 : index
    %5 = vector.load %arg4[%c0_4, %c0_5] : memref<32x128xf32, #tpu.memory_space<vmem>>, vector<32x128xf32>
    %cst = arith.constant dense<0.000000e+00> : vector<8x128xf32>
    %6 = tpu.matmul %3, %5, %cst {dimension_numbers = #tpu.dot_dimension_numbers<[1], [0], [0], [1], [0, 0, 1, 1], [], []>} : vector<8x32xf32>, vector<32x128xf32>, vector<8x128xf32> -> vector<8x128xf32>
    %7 = arith.addf %4, %6 : vector<8x128xf32>
    %c0_6 = arith.constant 0 : index
    %c0_7 = arith.constant 0 : index
    %8 = vector.load %arg6[%c0_6, %c0_7] : memref<8x128xf32, #tpu.memory_space<vmem>>, vector<8x128xf32>
    tpu.vector_store %arg6[%c0_6, %c0_7], %7 {strides = array<i32>} : memref<8x128xf32, #tpu.memory_space<vmem>>, vector<8x128xf32>,
    %c0_8 = arith.constant 0 : index
    %c0_9 = arith.constant 0 : index
    %9 = vector.load %arg7[%c0_8, %c0_9] : memref<8x1xf32, #tpu.memory_space<vmem>>, vector<8x1xf32>
    %10 = arith.mulf %3, %3 : vector<8x32xf32>
    %cst_10 = arith.constant dense<0.000000e+00> : vector<8xf32>
    %11 = vector.multi_reduction <add>, %10, %cst_10 [1] : vector<8x32xf32> to vector<8xf32>
    %12 = vector.shape_cast %11 : vector<8xf32> to vector<8x1xf32>
    %13 = arith.addf %9, %12 : vector<8x1xf32>
    %c0_11 = arith.constant 0 : index
    %c0_12 = arith.constant 0 : index
    %14 = vector.load %arg7[%c0_11, %c0_12] : memref<8x1xf32, #tpu.memory_space<vmem>>, vector<8x1xf32>
    tpu.vector_store %arg7[%c0_11, %c0_12], %13 {strides = array<i32>} : memref<8x1xf32, #tpu.memory_space<vmem>>, vector<8x1xf32>,
    %c0_i32_13 = arith.constant 0 : i32
    %15 = arith.cmpi eq, %arg2, %c0_i32_13 : i32
    %16 = arith.extui %15 : i1 to i32
    %c0_i32_14 = arith.constant 0 : i32
    %17 = arith.cmpi ne, %16, %c0_i32_14 : i32
    scf.if %17 {
      %c0_15 = arith.constant 0 : index
      %c0_16 = arith.constant 0 : index
      %18 = vector.load %arg6[%c0_15, %c0_16] : memref<8x128xf32, #tpu.memory_space<vmem>>, vector<8x128xf32>
      %c0_17 = arith.constant 0 : index
      %c0_18 = arith.constant 0 : index
      %19 = vector.load %arg7[%c0_17, %c0_18] : memref<8x1xf32, #tpu.memory_space<vmem>>, vector<8x1xf32>
      %c0_19 = arith.constant 0 : index
      %c0_20 = arith.constant 0 : index
      %20 = vector.load %arg5[%c0_19, %c0_20] : memref<1x128xf32, #tpu.memory_space<vmem>>, vector<1x128xf32>
      %21 = vector.broadcast %19 : vector<8x1xf32> to vector<8x128xf32>
      %22 = vector.broadcast %20 : vector<1x128xf32> to vector<8x128xf32>
      %23 = arith.addf %21, %22 : vector<8x128xf32>
      %24 = arith.addf %18, %18 : vector<8x128xf32>
      %25 = arith.subf %23, %24 : vector<8x128xf32>
      %c0_21 = arith.constant 0 : index
      %c0_22 = arith.constant 0 : index
      %26 = vector.load %arg6[%c0_21, %c0_22] : memref<8x128xf32, #tpu.memory_space<vmem>>, vector<8x128xf32>
      tpu.vector_store %arg6[%c0_21, %c0_22], %25 {strides = array<i32>} : memref<8x128xf32, #tpu.memory_space<vmem>>, vector<8x128xf32>,
    } else {
    }
    return
  }
  func.func @transform_0(%arg0: i32, %arg1: i32, %arg2: i32) -> (i32, i32) {
    %c0_i32 = arith.constant 0 : i32
    return %arg0, %arg2 : i32, i32
  }
  func.func @transform_1(%arg0: i32, %arg1: i32, %arg2: i32) -> (i32, i32) {
    %c0_i32 = arith.constant 0 : i32
    return %arg2, %arg1 : i32, i32
  }
  func.func @transform_2(%arg0: i32, %arg1: i32, %arg2: i32) -> (i32, i32) {
    %c0_i32 = arith.constant 0 : i32
    %c0_i32_0 = arith.constant 0 : i32
    return %c0_i32, %arg1 : i32, i32
  }
  func.func @transform_3(%arg0: i32, %arg1: i32, %arg2: i32) -> (i32, i32) {
    %c0_i32 = arith.constant 0 : i32
    return %arg0, %arg1 : i32, i32
  }
}

</mosaic_0001>

<bundles_post_ra>
// kernel: tpu_custom_call.1
= control target key start
LH: loop header
LB: loop body
LE: loop exit
PB: predicated region body
PF: predicated region fallthrough
CT: control target
= control target key end

     0   :  { %8 = vsyncpa [#allocation4], 0  ;;  %s310_s0 = inlined_call_operand.hbm [shape: f32[8,32], index: 0, kind: input, shape index: {}]   ;;  %s311_s1 = inlined_call_operand.hbm [shape: f32[32,128], index: 1, kind: input, shape index: {}]   ;;  %s312_s2 = inlined_call_operand.vmem [shape: f32[1,128], index: 2, kind: input, shape index: {}]   ;;  %s313_s3 = inlined_call_operand.hbm [shape: f32[8,128], index: 3, kind: output, shape index: {}]  }
   0x1   :  { %9 = vsyncpa [#allocation7], 0 }
   0x2   :  { %10 = vsyncpa [#allocation5], 0  ;;  %s268_s12 = smov [#allocation3]   ;;  %s269_s14 = smov [#allocation6]  }
   0x3   :  { %s17_s13 = sshll.u32 %s268_s12, 4  ;;  %s26_s15 = sshll.u32 %s269_s14, 4  ;;  %s18_s13 = int_to_ptr.vmem [resolvable:$true] %s17_s13  ;;  %s27_s15 = int_to_ptr.vmem [resolvable:$true] %s26_s15 }
   0x4   :  { %s210_s16 = scalar_lea.vmem %s18_s13, 128  ;;  %p215_p1 = scmp.lt.s32.totalorder %s18_s13, %s18_s13 }
   0x5   :  { %p211_p0 = scmp.ne.s32.totalorder %s18_s13, %s210_s16  ;;  %p216_p2 = scmp.lt.s32.totalorder %s210_s16, %s210_s16 }
   0x7   :  { %p217_p3 = por %p216_p2, %p215_p1 }
   0x9   :  { %p218_p4 = pnand %p217_p3, %p211_p0 }
   0xb   :  { %221 = shalt.err (!%p218_p4)
}
   0xc   :  { %20 = dma.hbm_to_vmem [thread:$0]  %s310_s0, 128, %s18_s13, [#allocation4]  }
   0xd   :  { %s230_s19 = scalar_lea.vmem %s27_s15, 512  ;;  %p235_p6 = scmp.lt.s32.totalorder %s27_s15, %s27_s15 }
   0xe   :  { %p231_p5 = scmp.ne.s32.totalorder %s27_s15, %s230_s19  ;;  %p236_p7 = scmp.lt.s32.totalorder %s230_s19, %s230_s19 }
  0x10   :  { %p237_p8 = por %p236_p7, %p235_p6 }
  0x12   :  { %p238_p9 = pnand %p237_p8, %p231_p5 }
  0x14   :  { %241 = shalt.err (!%p238_p9)
}
  0x15   :  { %s270_s20 = smov 128   ;;  %s271_s21 = smov 8  }
  0x16   :  { %32 = dma.hbm_to_vmem [thread:$0]  %s311_s1, 512, %s27_s15, [#allocation7], %s270_s20, %s270_s20, %s271_s21  }
  0x17   :  { %262 = dma.done.wait [#allocation4], 128  }
  0x18   :  { %263 = vsyncadd [#allocation4], 4294967168 }
  0x19   :  { %264 = dma.done.wait [#allocation7], 512  }
  0x1a   :  { %265 = vsyncadd [#allocation7], 4294966784  ;;  %vm46_vm0 = vcmask 7168   ;;  %v272_v0 = vmov 0.0   ;;  %vm273_vm1 = vmmov 0   ;;  %v48_v1 = vld [vmem:[#allocation3] sm:$0xff] }
  0x1b   :  { %182 = vmatprep.subr.mxu0 %v272_v0  ;;  %190 = vmatprep.mubr.msk.f32.mxu0 %vm273_vm1, %v272_v0  ;;  %47 = vst.msk [vmem:[#allocation2] sm:$0xff] %vm46_vm0, %v272_v0  ;;  %vm54_vm2 = vcmask 261120   ;;  %v53_v2 = vld [vmem:[#allocation6 + $0x18] sm:$0xff]  ;;  %v52_v3 = vld [vmem:[#allocation6 + $0x10] sm:$0xff]  ;;  %v131_v4 = vmul.f32 %v48_v1, %v48_v1  ;;  %v51_v5 = vld [vmem:[#allocation6 + $0x8] sm:$0xff]  ;;  %v274_v8 = vmov 0  }
  0x1c   :  { %183 = vmatpush3.msra.mxu0 %v53_v2  ;;  %v50_v7 = vld [vmem:[#allocation6] sm:$0xff]  ;;  %201 = vset.pattern.permute.xlu0 %v274_v8  ;;  %v176_v15 = vld [vmem:[%s312_s2] ss:$0 sm:$0xff]  ;;  %s275_s24 = smov [#allocation8]  }
  0x1d   :  { %184 = vmatprep.subr.mxu0 %v272_v0  ;;  %v132_v6 = vsel %vm54_vm2, %v131_v4, 0.0  ;;  %s165_s25 = sshll.u32 %s275_s24, 4  ;;  %s166_s25 = int_to_ptr.vmem [resolvable:$true] %s165_s25 }
  0x1e   :  { %185 = vmatpush3.msra.mxu0 %v52_v3  ;;  %133 = vadd.xlane.f32.xlu0 %v132_v6  ;;  %s242_s26 = scalar_lea.vmem %s166_s25, 128  ;;  %p247_p11 = scmp.lt.s32.totalorder %s166_s25, %s166_s25 }
  0x1f   :  { %186 = vmatprep.subr.mxu0 %v272_v0  ;;  %p243_p10 = scmp.ne.s32.totalorder %s166_s25, %s242_s26  ;;  %p248_p12 = scmp.lt.s32.totalorder %s242_s26, %s242_s26 }
  0x20   :  { %187 = vmatpush3.msra.mxu0 %v51_v5 }
  0x21   :  { %188 = vmatprep.subr.mxu0 %v272_v0  ;;  %p249_p13 = por %p248_p12, %p247_p11 }
  0x22   :  { %189 = vmatpush3.msra.mxu0 %v50_v7  ;;  %v130_v9 = vld [vmem:[#allocation2] sm:$0xff] }
  0x23   :  { %191 = vmatmul.mubr.msk.f32.vlgmr.msra.gmra.mxu0 %vm54_vm2, %v48_v1  ;;  %p250_p0 = pnand %p249_p13, %p243_p10 }
  0xa7   :  { %v134_v10 = vpop.xlane.xlu0 %133 }
  0xa8   :  { %v135_v11 = vadd.f32 %v134_v10, %v130_v9 }
  0xaa   :  { %137 = vst.msk [vmem:[#allocation2] sm:$0xff] %vm46_vm0, %v135_v11 }
  0xb1   :  { %v142_v12 = vld [vmem:[#allocation2] sm:$0xff] }
  0xb2   :  { %146 = vperm.xlu0 %201, %v142_v12  }
  0xe3   :  { %v124_v13 = vpop.f32.mrf.mxu0 }
  0xe4   :  { %v156_v16 = vadd.f32 %v124_v13, %v124_v13 }
  0xe5   :  { %v192_v14 = vpop.f32.mrf.mxu0 }
 0x12d   :  { %v147_v17 = vpop.permute.xlu0 %146 }
 0x12e   :  { %v155_v18 = vadd.f32 %v176_v15, %v147_v17 }
 0x130   :  { %v157_v19 = vsub.f32 %v155_v18, %v156_v16 }
 0x132   :  { %158 = vst [vmem:[#allocation8] sm:$0xff] %v157_v19 }
 0x133   :  { %253 = shalt.err (!%p250_p0)
}
 0x134   :  { %168 = dma.vmem_to_hbm [thread:$0]  %s166_s25, 128, %s313_s3, [#allocation5]  }
 0x135   :  { %266 = dma.done.wait [#allocation5], 128  }
 0x136   :  { %267 = vsyncadd [#allocation5], 4294967168 }
 0x137   :  { %172 = vsyncpa [#allocation4], 1 }
 0x138   :  { %173 = vsyncpa [#allocation7], 1 }
 0x139   :  { %174 = vsyncpa [#allocation5], 1 }

</bundles_post_ra>
